<compile_context>
chip_gen: v7x
topology: tpu7x:2x2x1
jax: 0.10.0
libtpu: 0.0.40
codegen_flags: <defaults>
</compile_context>

<pallas_src>
import functools

import jax
import jax.numpy as jnp
from jax.experimental import pallas as pl
from jax.experimental.pallas import tpu as pltpu

KW = 4                # conv kernel size
LRELU_SLOPE = 0.2
BN_EPS = 1e-5
LANE = 128            # channel padding granularity (lane-dense loads/stores)
ROW_ALIGN = 16        # row padding granularity (bf16 sublane tiling)
ROW_TILE_TARGET = 128  # target rows per in-kernel accumulation chunk


def _round_up(x, m):
    return ((x + m - 1) // m) * m


# --------------------------- fused per-layer Pallas kernel -------------------

def _fused_conv_layer_kernel(x_ref, w_ref, sc_ref, sh_ref, b_ref,
                             y_ref, st_ref, *scratch,
                             tap_offsets, pack, w_grid, wo, m_out, row_chunk,
                             apply_in_act, add_bias, compute_stats, slope):
    """One discriminator layer for one image.

    x_ref : (R_in, Cin_eff)  bf16  row-flattened (h*W_grid + w) pre-act input
            (for layer 0 this is a host-built im2col slab, Cin_eff = 16*cin pad)
    w_ref : (T, pack*Cin_eff, Cout_pad) bf16 tap-packed conv weights
    sc_ref, sh_ref : (1, Cin_eff) f32  previous layer's BN scale / shift
    b_ref : (1, Cout_pad)     f32  this layer's bias (zeros if unused)
    y_ref : (R_out, Cout_pad)      raw (pre-act) conv output of this layer
    st_ref: (8, Cout_pad)     f32  row0 = per-channel sum, row1 = sum of squares
    scratch: optional (R_in, Cin_eff) bf16 VMEM for the activated input slab
    """
    cout_pad = y_ref.shape[-1]
    r_out = y_ref.shape[0]

    if apply_in_act:
        # Fused previous-layer BatchNorm affine + LeakyReLU (VPU prologue).
        xs_ref = scratch[0]
        xf = x_ref[...].astype(jnp.float32)
        xf = xf * sc_ref[...] + sh_ref[...]
        xf = jnp.where(xf >= 0, xf, slope * xf)
        xs_ref[...] = xf.astype(jnp.bfloat16)
        src = xs_ref
    else:
        src = x_ref

    s_sum = jnp.zeros((1, cout_pad), jnp.float32)
    s_sq = jnp.zeros((1, cout_pad), jnp.float32)

    # Row-chunked direct conv: per chunk, T tap-packed MXU matmuls accumulated
    # into a small f32 accumulator that stays in vregs (no per-tap spill).
    n_chunks = -(-m_out // row_chunk)
    for c in range(n_chunks):
        r0 = c * row_chunk
        rows = min(row_chunk, m_out - r0)
        acc = jnp.zeros((rows, cout_pad), jnp.float32)
        for ti, off in enumerate(tap_offsets):
            base = off + r0
            if pack == 1:
                patch = src[base:base + rows, :]
            else:
                # Lane-concatenate the `pack` row-shifted views -> K = pack*Cin.
                patch = jnp.concatenate(
                    [src[base + d:base + d + rows, :] for d in range(pack)],
                    axis=-1)
            acc = acc + jnp.dot(patch, w_ref[ti],
                                preferred_element_type=jnp.float32)
        if add_bias:
            acc = acc + b_ref[...]

        # Single store of the chunk (no zero-then-overwrite).
        y_ref[r0:r0 + rows, :] = acc.astype(y_ref.dtype)

        if compute_stats:
            # Valid-column mask built in-kernel: chunk == whole image rows, so
            # the mask is a union of static [j*w_grid, j*w_grid + wo) intervals.
            lrow = jax.lax.broadcasted_iota(jnp.int32, (rows, cout_pad), 0)
            valid = lrow < wo
            for j in range(1, rows // w_grid):
                lo = j * w_grid
                valid = jnp.logical_or(valid, (lrow >= lo) & (lrow < lo + wo))
            masked = jnp.where(valid, acc, 0.0)
            s_sum = s_sum + jnp.sum(masked, axis=0, keepdims=True)
            s_sq = s_sq + jnp.sum(masked * masked, axis=0, keepdims=True)

    # Zero only the small tail rows consumed by the next layer's tap windows.
    if m_out < r_out:
        y_ref[m_out:r_out, :] = jnp.zeros((r_out - m_out, cout_pad), y_ref.dtype)

    if compute_stats:
        st_ref[0:1, :] = s_sum
        st_ref[1:2, :] = s_sq
    # (stats output left untouched when compute_stats is False -- never read.)


def _fused_conv_layer(x2, w_packed, in_scale, in_shift, bias_row, *,
                      n, r_in, r_out, m_out, w_grid, wo, tap_offsets, pack,
                      apply_in_act, add_bias, compute_stats, out_dtype):
    cin_eff = x2.shape[-1]
    n_taps, k_pack, cout_pad = w_packed.shape
    row_chunk = w_grid * max(1, ROW_TILE_TARGET // w_grid)

    kernel = functools.partial(
        _fused_conv_layer_kernel,
        tap_offsets=tap_offsets, pack=pack, w_grid=w_grid, wo=wo,
        m_out=m_out, row_chunk=row_chunk,
        apply_in_act=apply_in_act, add_bias=add_bias,
        compute_stats=compute_stats, slope=LRELU_SLOPE)

    scratch = ([pltpu.VMEM((r_in, cin_eff), jnp.bfloat16)]
               if apply_in_act else [])

    return pl.pallas_call(
        kernel,
        out_shape=(jax.ShapeDtypeStruct((n * r_out, cout_pad), out_dtype),
                   jax.ShapeDtypeStruct((n * 8, cout_pad), jnp.float32)),
        grid_spec=pltpu.PrefetchScalarGridSpec(
            num_scalar_prefetch=0,
            grid=(n,),
            in_specs=[
                pl.BlockSpec((r_in, cin_eff), lambda i: (i, 0)),          # acts
                pl.BlockSpec((n_taps, k_pack, cout_pad), lambda i: (0, 0, 0)),
                pl.BlockSpec((1, cin_eff), lambda i: (0, 0)),             # prev scale
                pl.BlockSpec((1, cin_eff), lambda i: (0, 0)),             # prev shift
                pl.BlockSpec((1, cout_pad), lambda i: (0, 0)),            # bias
            ],
            out_specs=[
                pl.BlockSpec((r_out, cout_pad), lambda i: (i, 0)),        # conv out
                pl.BlockSpec((8, cout_pad), lambda i: (i, 0)),            # BN stats
            ],
            scratch_shapes=scratch,
        ),
        compiler_params=pltpu.CompilerParams(
            dimension_semantics=("parallel",)),
    )(x2, w_packed, in_scale, in_shift, bias_row)


# ------------------------------ glue -----------------------------------------

def comp_strides(scale_factor, n_layers):
    strides = [1 for _ in range(n_layers)]
    assert scale_factor in [1, 2, 4]
    n_down = 0
    while True:
        scale_factor = scale_factor // 2
        if scale_factor <= 0:
            break
        n_down += 1
    for s in range(n_down):
        strides[s] = 2
    return strides, n_down


def build_params(key, input_nc, ndf, n_layers, scale_factor):
    """Deterministic synthetic parameters matching the PyTorch module's layer shapes."""
    strides, _ = comp_strides(scale_factor, n_layers)
    # (cin, cout, stride, has_norm, has_bias)
    cfg = [(input_nc, ndf, strides[0], False, True)]
    nf_mult = 1
    for nl in range(1, n_layers):
        nf_prev, nf_mult = nf_mult, min(2 ** nl, 8)
        cfg.append((ndf * nf_prev, ndf * nf_mult, strides[nl], True, False))
    nf_prev, nf_mult = nf_mult, min(2 ** n_layers, 8)
    cfg.append((ndf * nf_prev, ndf * nf_mult, 1, True, False))
    cfg.append((ndf * nf_mult, 1, 1, False, True))

    layers = []
    for li, (cin, cout, stride, has_norm, has_bias) in enumerate(cfg):
        kw_key, kb_key, kg_key, kbe_key = jax.random.split(
            jax.random.fold_in(key, li), 4)
        w = 0.1 * jax.random.normal(kw_key, (KW, KW, cin, cout), jnp.float32)   # HWIO
        b = (0.05 * jax.random.normal(kb_key, (cout,), jnp.float32)
             if has_bias else jnp.zeros((cout,), jnp.float32))
        layer = dict(w=w, b=b, stride=stride, norm=has_norm, bias=has_bias)
        if has_norm:
            layer["gamma"] = 1.0 + 0.1 * jax.random.normal(kg_key, (cout,), jnp.float32)
            layer["beta"] = 0.05 * jax.random.normal(kbe_key, (cout,), jnp.float32)
        layers.append(layer)
    return layers


def discriminator_forward(x_nchw, layers):
    """Pallas implementation of NLayerDiscriminator.forward. Input/output NCHW."""
    n, cin0, h0, w0 = x_nchw.shape
    num_layers = len(layers)
    w_grid = w0                      # constant column grid across all layers

    # TODO(synk): stride-2 layers (scale_factor 2/4) need strided row windows
    # plus w_grid repacking between layers; only scale_factor=1 is implemented.
    for layer in layers:
        if layer["stride"] != 1:
            raise NotImplementedError("scale_factor 2/4 not implemented")

    # Real spatial sizes per layer (valid 4x4 convs, stride 1).
    geo = []
    hin, win = h0, w0
    for layer in layers:
        ho, wo = hin - KW + 1, win - KW + 1
        geo.append((hin, win, ho, wo))
        hin, win = ho, wo
    m_outs = [ho * w_grid for (_, _, ho, _) in geo]

    # Rows stored per image for each layer's input slab (real rows + a small
    # tail so the deepest tap window stays inside the block; tiling-rounded).
    r_in = []
    for idx in range(num_layers):
        if idx == 0:
            need = m_outs[0]                                      # single-tap im2col
        else:
            need = m_outs[idx] + (KW - 1) * w_grid + (KW - 1)     # 4 packed kh taps
        r_in.append(_round_up(need, ROW_ALIGN))
    r_out = r_in[1:] + [_round_up(m_outs[-1], ROW_ALIGN)]

    # ----- layer 0: host-side im2col (real cin is tiny, 16x read amp is free).
    ho0, wo0 = geo[0][2], geo[0][3]
    xh = jnp.transpose(x_nchw, (0, 2, 3, 1)).astype(jnp.bfloat16)   # NHWC
    cols = []
    for kh in range(KW):
        for kw in range(KW):
            cols.append(xh[:, kh:kh + ho0, kw:kw + wo0, :])
    k0 = KW * KW * cin0
    k0_pad = _round_up(k0, LANE)
    p = jnp.concatenate(cols, axis=-1)                              # (N,ho,wo,16*cin)
    p = jnp.pad(p, ((0, 0), (0, 0), (0, w_grid - wo0), (0, k0_pad - k0)))
    p = p.reshape(n, ho0 * w_grid, k0_pad)
    p = jnp.pad(p, ((0, 0), (0, r_in[0] - ho0 * w_grid), (0, 0)))
    x = p.reshape(n * r_in[0], k0_pad)

    in_scale = jnp.ones((1, k0_pad), jnp.float32)
    in_shift = jnp.zeros((1, k0_pad), jnp.float32)

    out = None
    for idx, layer in enumerate(layers):
        hi, wi, ho, wo = geo[idx]
        cin, cout = layer["w"].shape[2], layer["w"].shape[3]
        cout_pad = _round_up(cout, LANE)
        m_out = m_outs[idx]
        last = idx == num_layers - 1

        if idx == 0:
            # All 16 taps folded into one K=16*cin (padded to 128) matmul.
            wp = layer["w"].reshape(KW * KW * cin, cout)
            wp = jnp.pad(wp, ((0, k0_pad - KW * KW * cin), (0, cout_pad - cout)))
            w_packed = wp[None].astype(jnp.bfloat16)                # (1, K0, Coutp)
            tap_offsets, pack = (0,), 1
        else:
            # Pack the 4 kw taps per kh into the contraction dim (K = 4*Cin_pad).
            cin_pad = int(x.shape[-1])
            wp = jnp.pad(layer["w"],
                         ((0, 0), (0, 0), (0, cin_pad - cin), (0, cout_pad - cout)))
            w_packed = wp.reshape(KW, KW * cin_pad, cout_pad).astype(jnp.bfloat16)
            tap_offsets, pack = tuple(kh * w_grid for kh in range(KW)), KW

        bias_row = jnp.pad(layer["b"], (0, cout_pad - cout)
                           ).astype(jnp.float32).reshape(1, cout_pad)

        y, stats = _fused_conv_layer(
            x, w_packed, in_scale, in_shift, bias_row,
            n=n, r_in=r_in[idx], r_out=r_out[idx], m_out=m_out,
            w_grid=w_grid, wo=wo, tap_offsets=tap_offsets, pack=pack,
            apply_in_act=(idx > 0),
            add_bias=layer["bias"],
            compute_stats=layer["norm"],
            out_dtype=jnp.float32 if last else jnp.bfloat16)

        if layer["norm"]:
            # Tiny cross-image reduction + scale/shift math (plain-JAX glue).
            st = stats.reshape(n, 8, cout_pad)
            count = float(n * ho * wo)
            mean = jnp.sum(st[:, 0, :], axis=0) / count
            var = jnp.maximum(jnp.sum(st[:, 1, :], axis=0) / count - mean * mean, 0.0)
            # Pad gamma/beta with 0 so padded channels get scale/shift == 0.
            gamma = jnp.pad(layer["gamma"], (0, cout_pad - cout))
            beta = jnp.pad(layer["beta"], (0, cout_pad - cout))
            scale = gamma * jax.lax.rsqrt(var + BN_EPS)
            in_scale = scale.reshape(1, cout_pad).astype(jnp.float32)
            in_shift = (beta - mean * scale).reshape(1, cout_pad).astype(jnp.float32)
        else:
            # Previous layer had no norm: only LeakyReLU is deferred (bias was
            # added in-kernel) -> identity affine for the next layer's prologue.
            in_scale = jnp.ones((1, cout_pad), jnp.float32)
            in_shift = jnp.zeros((1, cout_pad), jnp.float32)

        if last:
            out = y.reshape(n, r_out[idx], cout_pad)[:, :m_out, :cout]
            out = out.reshape(n, ho, w_grid, cout)[:, :, :wo, :]
        else:
            x = y   # already tail-padded & channel-padded for the next layer

    return jnp.transpose(out, (0, 3, 1, 2))          # NHWC -> NCHW


def reference_forward(x_nchw, layers):
    """Pure-JAX reference (lax.conv) with the same bf16 rounding points as the
    Pallas path (bf16 activations / weights, f32 accumulation and BN math)."""
    num_layers = len(layers)
    h = jnp.transpose(x_nchw, (0, 2, 3, 1))
    h = h.astype(jnp.bfloat16).astype(jnp.float32)
    scale = shift = None
    for idx, layer in enumerate(layers):
        if idx > 0:
            h = h * scale + shift
            h = jnp.where(h >= 0, h, LRELU_SLOPE * h)
            h = h.astype(jnp.bfloat16).astype(jnp.float32)
        s = layer["stride"]
        w = layer["w"].astype(jnp.bfloat16).astype(jnp.float32)
        y = jax.lax.conv_general_dilated(
            h, w, window_strides=(s, s), padding="VALID",
            dimension_numbers=("NHWC", "HWIO", "NHWC"))
        if layer["bias"]:
            y = y + layer["b"]
        if layer["norm"]:
            mean = jnp.mean(y, axis=(0, 1, 2))
            var = jnp.mean((y - mean) ** 2, axis=(0, 1, 2))
            scale = layer["gamma"] / jnp.sqrt(var + BN_EPS)
            shift = layer["beta"] - mean * scale
        else:
            scale = jnp.ones((y.shape[-1],), jnp.float32)
            shift = jnp.zeros((y.shape[-1],), jnp.float32)
        if idx == num_layers - 1:
            return jnp.transpose(y, (0, 3, 1, 2))
        h = y.astype(jnp.bfloat16).astype(jnp.float32)


# ------------------------------ main -----------------------------------------

if __name__ == "__main__":
    key = jax.random.PRNGKey(0)
    kx, kp = jax.random.split(key)

    # Small but consistent config: 5 valid 4x4 convs, each shrinks spatial by 3.
    input_nc, ndf, n_layers, scale_factor = 4, 8, 3, 1
    N, H, W = 2, 20, 20
    x = jax.random.normal(kx, (N, input_nc, H, W), jnp.float32)   # NCHW as in PyTorch

    layers = build_params(kp, input_nc, ndf, n_layers, scale_factor)

    out = jax.block_until_ready(discriminator_forward(x, layers))
    ref = jax.block_until_ready(reference_forward(x, layers))

    assert out.shape == ref.shape == (N, 1, 5, 5), (out.shape, ref.shape)
    max_err = float(jnp.max(jnp.abs(out - ref)))
    assert jnp.allclose(out, ref, rtol=2e-2, atol=2e-2), max_err

    print("KERNEL_OK")
</pallas_src>

<mosaic_0001>
module attributes {stable_mosaic.version = 11 : i64} {
  func.func @_fused_conv_layer_kernel(%arg0: i32, %arg1: memref<352x128xbf16, #tpu.memory_space<vmem>>, %arg2: memref<1x128x128xbf16, #tpu.memory_space<vmem>>, %arg3: memref<1x128xf32, #tpu.memory_space<vmem>>, %arg4: memref<1x128xf32, #tpu.memory_space<vmem>>, %arg5: memref<1x128xf32, #tpu.memory_space<vmem>>, %arg6: memref<352x128xbf16, #tpu.memory_space<vmem>>, %arg7: memref<8x128xf32, #tpu.memory_space<vmem>>) attributes {dimension_semantics = [#tpu.dimension_semantics<parallel>], iteration_bounds = array<i64: 2>, scalar_prefetch = 0 : i64, scratch_operands = 0 : i64, tpu.core_type = #tpu.core_type<tc>, window_params = [{transform_indices = @transform_0, window_bounds = array<i64: 352, 128>}, {pipeline_mode = #tpu.pipeline_mode<synchronous>, transform_indices = @transform_1, window_bounds = array<i64: 1, 128, 128>}, {pipeline_mode = #tpu.pipeline_mode<synchronous>, transform_indices = @transform_2, window_bounds = array<i64: 1, 128>}, {pipeline_mode = #tpu.pipeline_mode<synchronous>, transform_indices = @transform_3, window_bounds = array<i64: 1, 128>}, {pipeline_mode = #tpu.pipeline_mode<synchronous>, transform_indices = @transform_4, window_bounds = array<i64: 1, 128>}, {transform_indices = @transform_5, window_bounds = array<i64: 352, 128>}, {transform_indices = @transform_6, window_bounds = array<i64: 8, 128>}]} {
    %cst = arith.constant 0.000000e+00 : f32
    %0 = vector.broadcast %cst : f32 to vector<120x128xf32>
    %c0 = arith.constant 0 : index
    %c0_0 = arith.constant 0 : index
    %1 = vector.load %arg1[%c0, %c0_0] : memref<352x128xbf16, #tpu.memory_space<vmem>>, vector<120x128xbf16>
    %c0_1 = arith.constant 0 : index
    %c0_2 = arith.constant 0 : index
    %c0_3 = arith.constant 0 : index
    %2 = vector.load %arg2[%c0_1, %c0_2, %c0_3] : memref<1x128x128xbf16, #tpu.memory_space<vmem>>, vector<1x128x128xbf16>
    %3 = vector.shape_cast %2 : vector<1x128x128xbf16> to vector<128x128xbf16>
    %cst_4 = arith.constant dense<0.000000e+00> : vector<120x128xf32>
    %4 = tpu.matmul %1, %3, %cst_4 {dimension_numbers = #tpu.dot_dimension_numbers<[1], [0], [0], [1], [0, 0, 1, 1], [], []>} : vector<120x128xbf16>, vector<128x128xbf16>, vector<120x128xf32> -> vector<120x128xf32>
    %5 = arith.addf %0, %4 : vector<120x128xf32>
    %c0_5 = arith.constant 0 : index
    %c0_6 = arith.constant 0 : index
    %6 = vector.load %arg5[%c0_5, %c0_6] : memref<1x128xf32, #tpu.memory_space<vmem>>, vector<1x128xf32>
    %7 = vector.broadcast %6 : vector<1x128xf32> to vector<120x128xf32>
    %8 = arith.addf %5, %7 : vector<120x128xf32>
    %9 = arith.truncf %8 : vector<120x128xf32> to vector<120x128xbf16>
    %c0_7 = arith.constant 0 : index
    %c0_8 = arith.constant 0 : index
    %10 = vector.load %arg6[%c0_7, %c0_8] : memref<352x128xbf16, #tpu.memory_space<vmem>>, vector<120x128xbf16>
    tpu.vector_store %arg6[%c0_7, %c0_8], %9 {strides = array<i32>} : memref<352x128xbf16, #tpu.memory_space<vmem>>, vector<120x128xbf16>,
    %cst_9 = arith.constant 0.000000e+00 : f32
    %11 = vector.broadcast %cst_9 : f32 to vector<120x128xf32>
    %c120 = arith.constant 120 : index
    %c0_10 = arith.constant 0 : index
    %12 = vector.load %arg1[%c120, %c0_10] : memref<352x128xbf16, #tpu.memory_space<vmem>>, vector<120x128xbf16>
    %c0_11 = arith.constant 0 : index
    %c0_12 = arith.constant 0 : index
    %c0_13 = arith.constant 0 : index
    %13 = vector.load %arg2[%c0_11, %c0_12, %c0_13] : memref<1x128x128xbf16, #tpu.memory_space<vmem>>, vector<1x128x128xbf16>
    %14 = vector.shape_cast %13 : vector<1x128x128xbf16> to vector<128x128xbf16>
    %cst_14 = arith.constant dense<0.000000e+00> : vector<120x128xf32>
    %15 = tpu.matmul %12, %14, %cst_14 {dimension_numbers = #tpu.dot_dimension_numbers<[1], [0], [0], [1], [0, 0, 1, 1], [], []>} : vector<120x128xbf16>, vector<128x128xbf16>, vector<120x128xf32> -> vector<120x128xf32>
    %16 = arith.addf %11, %15 : vector<120x128xf32>
    %c0_15 = arith.constant 0 : index
    %c0_16 = arith.constant 0 : index
    %17 = vector.load %arg5[%c0_15, %c0_16] : memref<1x128xf32, #tpu.memory_space<vmem>>, vector<1x128xf32>
    %18 = vector.broadcast %17 : vector<1x128xf32> to vector<120x128xf32>
    %19 = arith.addf %16, %18 : vector<120x128xf32>
    %20 = arith.truncf %19 : vector<120x128xf32> to vector<120x128xbf16>
    %c120_17 = arith.constant 120 : index
    %c0_18 = arith.constant 0 : index
    %21 = vector.load %arg6[%c120_17, %c0_18] : memref<352x128xbf16, #tpu.memory_space<vmem>>, vector<120x128xbf16>
    tpu.vector_store %arg6[%c120_17, %c0_18], %20 {strides = array<i32>} : memref<352x128xbf16, #tpu.memory_space<vmem>>, vector<120x128xbf16>,
    %cst_19 = arith.constant 0.000000e+00 : f32
    %22 = vector.broadcast %cst_19 : f32 to vector<100x128xf32>
    %c240 = arith.constant 240 : index
    %c0_20 = arith.constant 0 : index
    %23 = vector.load %arg1[%c240, %c0_20] : memref<352x128xbf16, #tpu.memory_space<vmem>>, vector<100x128xbf16>
    %c0_21 = arith.constant 0 : index
    %c0_22 = arith.constant 0 : index
    %c0_23 = arith.constant 0 : index
    %24 = vector.load %arg2[%c0_21, %c0_22, %c0_23] : memref<1x128x128xbf16, #tpu.memory_space<vmem>>, vector<1x128x128xbf16>
    %25 = vector.shape_cast %24 : vector<1x128x128xbf16> to vector<128x128xbf16>
    %cst_24 = arith.constant dense<0.000000e+00> : vector<100x128xf32>
    %26 = tpu.matmul %23, %25, %cst_24 {dimension_numbers = #tpu.dot_dimension_numbers<[1], [0], [0], [1], [0, 0, 1, 1], [], []>} : vector<100x128xbf16>, vector<128x128xbf16>, vector<100x128xf32> -> vector<100x128xf32>
    %27 = arith.addf %22, %26 : vector<100x128xf32>
    %c0_25 = arith.constant 0 : index
    %c0_26 = arith.constant 0 : index
    %28 = vector.load %arg5[%c0_25, %c0_26] : memref<1x128xf32, #tpu.memory_space<vmem>>, vector<1x128xf32>
    %29 = vector.broadcast %28 : vector<1x128xf32> to vector<100x128xf32>
    %30 = arith.addf %27, %29 : vector<100x128xf32>
    %31 = arith.truncf %30 : vector<100x128xf32> to vector<100x128xbf16>
    %c240_27 = arith.constant 240 : index
    %c0_28 = arith.constant 0 : index
    %32 = vector.load %arg6[%c240_27, %c0_28] : memref<352x128xbf16, #tpu.memory_space<vmem>>, vector<100x128xbf16>
    tpu.vector_store %arg6[%c240_27, %c0_28], %31 {strides = array<i32>} : memref<352x128xbf16, #tpu.memory_space<vmem>>, vector<100x128xbf16>,
    %cst_29 = arith.constant 0.000000e+00 : bf16
    %33 = vector.broadcast %cst_29 : bf16 to vector<12x128xbf16>
    %c340 = arith.constant 340 : index
    %c0_30 = arith.constant 0 : index
    %34 = vector.load %arg6[%c340, %c0_30] : memref<352x128xbf16, #tpu.memory_space<vmem>>, vector<12x128xbf16>
    tpu.vector_store %arg6[%c340, %c0_30], %33 {strides = array<i32>} : memref<352x128xbf16, #tpu.memory_space<vmem>>, vector<12x128xbf16>,
    return
  }
  func.func @transform_0(%arg0: i32) -> (i32, i32) {
    %c0_i32 = arith.constant 0 : i32
    %c0_i32_0 = arith.constant 0 : i32
    return %arg0, %c0_i32 : i32, i32
  }
  func.func @transform_1(%arg0: i32) -> (i32, i32, i32) {
    %c0_i32 = arith.constant 0 : i32
    %c0_i32_0 = arith.constant 0 : i32
    %c0_i32_1 = arith.constant 0 : i32
    %c0_i32_2 = arith.constant 0 : i32
    return %c0_i32, %c0_i32_0, %c0_i32_1 : i32, i32, i32
  }
  func.func @transform_2(%arg0: i32) -> (i32, i32) {
    %c0_i32 = arith.constant 0 : i32
    %c0_i32_0 = arith.constant 0 : i32
    %c0_i32_1 = arith.constant 0 : i32
    return %c0_i32, %c0_i32_0 : i32, i32
  }
  func.func @transform_3(%arg0: i32) -> (i32, i32) {
    %c0_i32 = arith.constant 0 : i32
    %c0_i32_0 = arith.constant 0 : i32
    %c0_i32_1 = arith.constant 0 : i32
    return %c0_i32, %c0_i32_0 : i32, i32
  }
  func.func @transform_4(%arg0: i32) -> (i32, i32) {
    %c0_i32 = arith.constant 0 : i32
    %c0_i32_0 = arith.constant 0 : i32
    %c0_i32_1 = arith.constant 0 : i32
    return %c0_i32, %c0_i32_0 : i32, i32
  }
  func.func @transform_5(%arg0: i32) -> (i32, i32) {
    %c0_i32 = arith.constant 0 : i32
    %c0_i32_0 = arith.constant 0 : i32
    return %arg0, %c0_i32 : i32, i32
  }
  func.func @transform_6(%arg0: i32) -> (i32, i32) {
    %c0_i32 = arith.constant 0 : i32
    %c0_i32_0 = arith.constant 0 : i32
    return %arg0, %c0_i32 : i32, i32
  }
}

</mosaic_0001>

<bundles_post_ra>
// kernel: tpu_custom_call.1
= control target key start
LH: loop header
LB: loop body
LE: loop exit
PB: predicated region body
PF: predicated region fallthrough
CT: control target
= control target key end

     0   :  { %12 = vsyncpa [#allocation3], 0  ;;  %s2443_s0 = inlined_call_operand.hbm [shape: bf16[704,128], index: 0, kind: input, shape index: {}]   ;;  %s2444_s1 = inlined_call_operand.hbm [shape: bf16[1,128,128], index: 1, kind: input, shape index: {}]   ;;  %s2445_s2 = inlined_call_operand.vmem [shape: f32[1,128], index: 2, kind: input, shape index: {}]   ;;  %s2446_s3 = inlined_call_operand.vmem [shape: f32[1,128], index: 3, kind: input, shape index: {}]   ;;  %s2447_s4 = inlined_call_operand.vmem [shape: f32[1,128], index: 4, kind: input, shape index: {}]   ;;  %s2448_s5 = inlined_call_operand.hbm [shape: bf16[704,128], index: 5, kind: output, shape index: {0}]   ;;  %s2449_s6 = inlined_call_operand.hbm [shape: f32[16,128], index: 6, kind: output, shape index: {1}]  }
   0x1   :  { %14 = vsyncpa [#allocation3 + $0x1], 0 }
   0x2   :  { %15 = vsyncpa [#allocation6], 0 }
   0x3   :  { %16 = vsyncpa [#allocation4], 0 }
   0x4   :  { %18 = vsyncpa [#allocation4 + $0x1], 0 }
   0x5   :  { %19 = vsyncpa [#allocation9], 0 }
   0x6   :  { %21 = vsyncpa [#allocation9 + $0x1], 0  ;;  %s2084_s2 = smov 0   ;;  %s2086_s21 = smov 0  }
   0x7   :  { %s2088_s3 = smov 0   ;;  %s2090_s22 = smov 0  }
   0x8 LB: > { %s2105_s23 = sadd.s32 4294967295, %s2036_s22   ;;  %s1334_s24 = sadd.s32 4294967294, %s2036_s22   ;;  %s2036_s22 = sphi %s2090_s22, %s2469_s22   ;;  %s2032_s3 = sphi %s2088_s3, %s2468_s3   ;;  %s2028_s21 = sphi %s2086_s21, %s2467_s21   ;;  %s2024_s2 = sphi %s2084_s2, %s2466_s2  }
   0x9   : > { %p47_p0 = scmp.ne.s32.totalorder %s2028_s21, %s2024_s2  ;;  %p2450_p1 = scmp.eq.s32.totalorder %s2105_s23, 0 }
   0xa   : > { %p161_p3 = scmp.eq.s32.totalorder %s1334_s24, 1  ;;  %p1335_p5 = scmp.ge.s32.totalorder %s2036_s22, 1 }
   0xb   : > { %p2114_p4 = por %p2450_p1, %p47_p0  ;;  %p194_p7 = scmp.lt.s32.totalorder %s2036_s22, 3 }
   0xc   : > { %p2119_p6 = por %p161_p3, %p47_p0  ;;  %s2038_s28 = smov [#allocation5]  }
   0xd   : > { %s2453_s25 = scalar_select %p2114_p4, 1, 0 }
   0xe   : > { %s2454_s26 = scalar_select %p2119_p6, 1, 0 }
   0xf   : > { %p2124_p8 = pnand %p1335_p5, %p194_p7  ;;  %s206_s29 = sshll.u32 %s2038_s28, 4  ;;  %s2128_s29 = int_to_ptr.vmem [resolvable:$true] %s206_s29 }
  0x10   : > { %s2140_s7 = sadd.s32 1, %s2036_s22   ;;  %s34_s8 = sadd.s32 1, %s2032_s3 }
  0x11   : > { %s2455_s27 = scalar_select %p2124_p8, 1, 0 }
  0x12   : > { %p1770_p9 = pneg %p2124_p8  ;;  %s31_s9 = ssub.s32 %s2036_s22, %s2140_s7 }
  0x13   : > { %s1876_s12 = scalar_lea.hbm %s2444_s1, 1024 }
  0x14   : > { %p2135_p11 = pnand %p1770_p9, %p2450_p1  ;;  %p1877_p12 = scmp.ne.s32.totalorder %s2444_s1, %s1876_s12 }
  0x15   : > { %p1883_p5 = scmp.lt.u32.totalorder %s1876_s12, %s2444_s1 }
  0x16   : > { %p1878_p13 = pneg %p2135_p11 }
  0x18   : > { %p1879_p0 = pnand %p1878_p13, %p1877_p12 }
  0x1a   : > { %p1880_p3 = pneg %p1879_p0 }
  0x1c   : > { %p1885_p7 = pnand %p1883_p5, %p1880_p3 }
  0x1e   : > { %1888 = shalt.err (!%p1885_p7)
}
  0x1f   : > { %s1889_s17 = scalar_lea.vmem %s2128_s29, 1024  ;;  %p1897_p2 = scmp.lt.s32.totalorder %s2128_s29, %s2128_s29 }
  0x20   : > { %p1890_p9 = scmp.ne.s32.totalorder %s2128_s29, %s1889_s17  ;;  %p1898_p6 = scmp.lt.s32.totalorder %s1889_s17, %s1889_s17 }
  0x22   : > { %p1892_p10 = pnand %p1890_p9, %p1878_p13  ;;  %p1899_p4 = por %p1898_p6, %p1897_p2 }
  0x24   : > { %p1893_p1 = pneg %p1892_p10 }
  0x26   : > { %p1900_p8 = pnand %p1899_p4, %p1893_p1 }
  0x28   : > { %1903 = shalt.err (!%p1900_p8)
}
  0x29   : > { %s2039_s18 = smov 64   ;;  %s2040_s19 = smov 4  }
  0x2a   : > { %1773 = dma.hbm_to_vmem [thread:$0]  (!%p2135_p11), %s2444_s1, 1024, %s2128_s29, [#allocation6], %s2039_s18, %s2039_s18, %s2040_s19  }
  0x2b   : > { %p32_p1 = scmp.eq.s32.totalorder %s31_s9, 0  ;;  %p41_p2 = scmp.ne.s32.totalorder %s2032_s3, %s2028_s21 }
  0x2c   : > { %p42_p4 = scmp.eq.s32.totalorder %s2036_s22, 0  ;;  %p1786_p6 = scmp.lt.s32.totalorder %s2036_s22, 2 }
  0x2d   : > { %s2174_s28 = scalar_select %p32_p1, %s2032_s3, %s34_s8  }
  0x2e   : > { %p43_p8 = por %p42_p4, %p41_p2  ;;  %p2457_p10 = scmp.eq.s32.totalorder %s2105_s23, 1 }
  0x2f   : > { %s229_s30 = sand.u32 1, %s2032_s3   ;;  %s1439_s11 = smul.u32 2816, %s2036_s22 }
  0x30   : > { %p2178_p12 = por %p2457_p10, %p41_p2  ;;  %s1758_s12 = smul.u32 176, %s229_s30 }
  0x31   : > { %p2184_p13 = pnand %p1786_p6, %p43_p8  ;;  %s2191_s8 = scalar_lea.hbm %s2443_s0, %s1439_s11 }
  0x32   : > { %s233_s14 = scalar_lea.vmem [#allocation2], %s1758_s12  ;;  %s2195_s16 = scalar_lea.sflag [#allocation3], %s229_s30 }
  0x33   : > { %s240_s15 = sshll.u32 %s233_s14, 4  ;;  %s1904_s17 = scalar_lea.hbm %s2191_s8, 2816  ;;  %s2193_s15 = int_to_ptr.vmem [resolvable:$true] %s240_s15 }
  0x34   : > { %p1905_p11 = scmp.ne.s32.totalorder %s2191_s8, %s1904_s17  ;;  %p1906_p0 = pneg %p2184_p13 }
  0x35   : > { %s1909_s11 = scalar_lea.hbm %s2443_s0, 5632  ;;  %p1910_p7 = scmp.lt.u32.totalorder %s2191_s8, %s2443_s0 }
  0x36   : > { %p1907_p3 = pnand %p1906_p0, %p1905_p11  ;;  %p1911_p9 = scmp.lt.u32.totalorder %s1909_s11, %s1904_s17 }
  0x37   : > { %p1913_p2 = scmp.lt.u32.totalorder %s1904_s17, %s2191_s8 }
  0x38   : > { %p1908_p5 = pneg %p1907_p3  ;;  %p1912_p1 = por %p1911_p9, %p1910_p7 }
  0x3a   : > { %p1914_p4 = por %p1913_p2, %p1912_p1 }
  0x3c   : > { %p1915_p6 = pnand %p1914_p4, %p1908_p5 }
  0x3e   : > { %1918 = shalt.err (!%p1915_p6)
}
  0x3f   : > { %s1919_s30 = scalar_lea.vmem %s2193_s15, 2816  ;;  %s2041_s12 = smov [#allocation2]  }
  0x40   : > { %p1920_p8 = scmp.ne.s32.totalorder %s2193_s15, %s1919_s30  ;;  %s1924_s14 = sshll.u32 %s2041_s12, 4  ;;  %s1925_s14 = int_to_ptr.vmem [resolvable:$false] %s1924_s14 }
  0x41   : > { %s1926_s20 = scalar_lea.vmem %s1925_s14, 5632  ;;  %p1927_p3 = scmp.lt.s32.totalorder %s2193_s15, %s1925_s14 }
  0x42   : > { %p1922_p10 = pnand %p1920_p8, %p1906_p0  ;;  %p1928_p7 = scmp.lt.s32.totalorder %s1926_s20, %s1919_s30 }
  0x44   : > { %p1923_p11 = pneg %p1922_p10  ;;  %p1929_p9 = por %p1928_p7, %p1927_p3 }
  0x46   : > { %p1930_p1 = pnand %p1929_p9, %p1923_p11 }
  0x48   : > { %1933 = shalt.err (!%p1930_p1)
}
  0x49   : > { %1777 = dma.hbm_to_vmem [thread:$0]  (!%p2184_p13), %s2191_s8, 2816, %s2193_s15, %s2195_s16, %s2039_s18, %s2039_s18, %s2040_s19  }
  0x4a   : > { %p2460_p0 = scmp.ne.s32.totalorder %s2455_s27, 0 }
  0x4b   : > { %s2229_s17 = sand.u32 (!%p2460_p0), 1, %s2028_s21   ;;  %p2461_p5 = scmp.ne.s32.totalorder (!%p2460_p0), %s2453_s25, 0 }
  0x4c   : > { %252 = sbr.rel (%p2460_p0) target bundleno = 411 (0x19b), region = 40  ;;  %s255_s11 = scalar_lea.sflag (!%p2460_p0), [#allocation3], %s2229_s17 }
  0x4d   : > { %s1759_s24 = smul.u32 (!%p2460_p0), 176, %s2229_s17 }
  0x4f   : > { %s2235_s13 = scalar_lea.vmem (!%p2460_p0), [#allocation2], %s1759_s24 }
  0x53   : > { %2007 = dma.done.wait (%p2461_p5), %s255_s11, 2816  }
  0x54   : > { %2009 = vsyncadd (%p2461_p5), %s255_s11, 4294964480  ;;  %p2462_p13 = scmp.eq.s32.totalorder %s2105_s23, 0 }
  0x56   : > { %2011 = dma.done.wait (%p2462_p13), [#allocation6], 1024   ;;  %p2463_p2 = pmov %p2462_p13 }
  0x57   : > { %v2042_v0 = vmov 0.0   ;;  %vm2043_vm0 = vmmov 0   ;;  %v1829_v1 = vld [vmem:[#allocation5] sm:$0xff]   ;;  %v1830_v2 = vld [vmem:[#allocation5 + $0x8] sm:$0xff]   ;;  %v1831_v4 = vld [vmem:[#allocation5 + $0x10] sm:$0xff]   ;;  %s1434_s25 = sshll.u32 %s2229_s17, 3 }
  0x58   : > { %2013 = vsyncadd (%p2463_p2), [#allocation6], 4294966272  ;;  %1714 = vmatprep.subr.bf16.mxu0 %v2042_v0  ;;  %1730 = vmatprep.mubr.msk.bf16.mxu0 %vm2043_vm0, %v2042_v0  ;;  %v1832_v3 = vld [vmem:[#allocation5] sm:$0xff]   ;;  %v1834_v5 = vld [vmem:[#allocation5 + $0x8] sm:$0xff]   ;;  %s2293_s27 = scalar_lea.vmem [#allocation7], %s1759_s24  ;;  %v2044_v48 = vmov 0  }
  0x59   : > { %1650 = vmatprep.subr.bf16.mxu1 %v1829_v1  ;;  %1715 = vmatpush3.bf16.msra.mxu0 %v1832_v3  ;;  %v1833_v6 = vld [vmem:[#allocation5 + $0x18] sm:$0xff]   ;;  %v1836_v7 = vld [vmem:[#allocation5 + $0x10] sm:$0xff]   ;;  %v1835_v8 = vld [vmem:[#allocation5 + $0x20] sm:$0xff]   ;;  %1185 = vst [vmem:[%s2293_s27 + $0xa8] sm:$0xc] %v2044_v48  ;;  %s1436_s18 = sshll.u32 %s2105_s23, 7 }
  0x5a   : > { %1651 = vmatpush3.bf16.msra.mxu1 %v1829_v1  ;;  %1716 = vmatprep.subr.bf16.mxu0 %v2042_v0  ;;  %v1838_v9 = vld [vmem:[#allocation5 + $0x18] sm:$0xff]   ;;  %v1843_v10 = vld [vmem:[%s2235_s13] sm:$0xff]   ;;  %v1837_v11 = vld [vmem:[#allocation5 + $0x28] sm:$0xff]   ;;  %1186 = vst [vmem:[%s2293_s27 + $0xac] sm:$0xf] %v2044_v48  ;;  %s2301_s15 = scalar_lea.hbm %s2449_s6, %s1436_s18  ;;  %s1196_s16 = scalar_lea.vmem [#allocation8], %s1434_s25 }
  0x5b   : > { %1652 = vmatprep.subr.bf16.mxu1 %v1830_v2  ;;  %1666 = vmatprep.mubr.bf16.mxu1 %v1843_v10  ;;  %v1840_v12 = vld [vmem:[#allocation5 + $0x20] sm:$0xff]   ;;  %v1839_v13 = vld [vmem:[#allocation5 + $0x30] sm:$0xff]   ;;  %v1842_v14 = vld [vmem:[#allocation5 + $0x28] sm:$0xff]   ;;  %s1222_s29 = sshll.u32 %s1196_s16, 4  ;;  %s1193_s9 = scalar_lea.sflag [#allocation9], %s2229_s17  ;;  %s1223_s29 = int_to_ptr.vmem [resolvable:$true] %s1222_s29 }
  0x5c   : > { %v1841_v15 = vld [vmem:[#allocation5 + $0x38] sm:$0xff]   ;;  %v1846_v16 = vld [vmem:[#allocation5 + $0x30] sm:$0xff]   ;;  %v1845_v18 = vld [vmem:[#allocation5] sm:$0xff]   ;;  %s1934_s30 = scalar_lea.vmem %s1223_s29, 128  ;;  %s2045_s12 = smov [#allocation8]  }
  0x5d   : > { %1717 = vmatpush3.bf16.msra.mxu0 %v1834_v5  ;;  %v1844_v17 = vld [vmem:[%s2235_s13 + $0x8] sm:$0xff]   ;;  %v1849_v21 = vld [vmem:[%s2235_s13 + $0x10] sm:$0xff]   ;;  %v1852_v22 = vld [vmem:[%s2235_s13 + $0x78] sm:$0xff]   ;;  %p1935_p4 = scmp.ne.s32.totalorder %s1223_s29, %s1934_s30  ;;  %s1938_s14 = sshll.u32 %s2045_s12, 4  ;;  %s1939_s14 = int_to_ptr.vmem [resolvable:$false] %s1938_s14 }
  0x5e   : > { %1653 = vmatpush3.bf16.msra.mxu1 %v1830_v2  ;;  %1718 = vmatprep.subr.bf16.mxu0 %v2042_v0  ;;  %v1848_v19 = vld [vmem:[#allocation5 + $0x38] sm:$0xff]   ;;  %v1847_v20 = vld [vmem:[#allocation5 + $0x8] sm:$0xff]   ;;  %v1851_v23 = vld [vmem:[#allocation5 + $0x10] sm:$0xff]   ;;  %s1940_s20 = scalar_lea.vmem %s1939_s14, 256  ;;  %p1941_p10 = scmp.lt.s32.totalorder %s1223_s29, %s1939_s14 }
  0x5f   : > { %1654 = vmatprep.subr.bf16.mxu1 %v1831_v4  ;;  %v1850_v24 = vld [vmem:[%s2235_s13 + $0x18] sm:$0xff]   ;;  %v1854_v26 = vld [vmem:[%s2235_s13 + $0x20] sm:$0xff]   ;;  %v1855_v29 = vld [vmem:[%s2235_s13 + $0x28] sm:$0xff]   ;;  %p1936_p6 = pnand %p1935_p4, %p2178_p12  ;;  %p1942_p11 = scmp.lt.s32.totalorder %s1940_s20, %s1934_s30 }
  0x60   : > { %v1853_v25 = vld [vmem:[#allocation5 + $0x18] sm:$0xff]   ;;  %v1857_v27 = vld [vmem:[%s2235_s13 + $0x80] sm:$0xff]   ;;  %v1859_v30 = vld [vmem:[%s2235_s13 + $0x30] sm:$0xff]  }
  0x61   : > { %1719 = vmatpush3.bf16.msra.mxu0 %v1836_v7  ;;  %v1856_v28 = vld [vmem:[#allocation5 + $0x20] sm:$0xff]   ;;  %v1858_v31 = vld [vmem:[#allocation5 + $0x28] sm:$0xff]   ;;  %v1861_v33 = vld [vmem:[#allocation5 + $0x30] sm:$0xff]   ;;  %p1937_p8 = pneg %p1936_p6  ;;  %p1943_p3 = por %p1942_p11, %p1941_p10 }
  0x62   : > { %1655 = vmatpush3.bf16.msra.mxu1 %v1831_v4  ;;  %1720 = vmatprep.subr.bf16.mxu0 %v2042_v0  ;;  %v1862_v32 = vld [vmem:[%s2235_s13 + $0x88] sm:$0xff]   ;;  %v1860_v34 = vld [vmem:[%s2235_s13 + $0x38] ss:$0 sps:$4 sm:$0xff]   ;;  %v1864_v35 = vld [vmem:[%s2235_s13 + $0x3c] sm:$0xff]  }
  0x63   : > { %1656 = vmatprep.subr.bf16.mxu1 %v1833_v6  ;;  %v1863_v36 = vld [vmem:[#allocation5 + $0x38] sm:$0xff]   ;;  %v1866_v37 = vld [vmem:[%s2235_s13 + $0x90] sm:$0xff]   ;;  %v1872_v43 = vld [vmem:[%s2235_s13 + $0xa0] sm:$0xff]   ;;  %p1944_p7 = pnand %p1943_p3, %p1937_p8 }
  0x64   : > { %v1865_v38 = vld [vmem:[%s2235_s13 + $0x44] sm:$0xff]   ;;  %v1867_v39 = vld [vmem:[%s2235_s13 + $0x4c] sm:$0xff]   ;;  %v1869_v40 = vld [vmem:[%s2235_s13 + $0x98] sm:$0xff]  }
  0x65   : > { %1721 = vmatpush3.bf16.msra.mxu0 %v1838_v9  ;;  %v1868_v41 = vld [vmem:[%s2235_s13 + $0x54] sm:$0xff]   ;;  %v1870_v42 = vld [vmem:[%s2235_s13 + $0x5c] sm:$0xff]   ;;  %v1871_v44 = vld [vmem:[%s2235_s13 + $0x64] sm:$0xff]  }
  0x66   : > { %1657 = vmatpush3.bf16.msra.mxu1 %v1833_v6  ;;  %1722 = vmatprep.subr.bf16.mxu0 %v2042_v0  ;;  %v1873_v45 = vld [vmem:[%s2235_s13 + $0x6c] sm:$0xff]   ;;  %v1875_v46 = vld [vmem:[%s2235_s13 + $0xa8] ss:$0 sps:$4 sm:$0x33]   ;;  %v1874_v47 = vld [vmem:[%s2235_s13 + $0x74] ss:$0 sps:$4 sm:$0xff]  }
  0x67   : > { %1658 = vmatprep.subr.bf16.mxu1 %v1835_v8 }
  0x69   : > { %1723 = vmatpush3.bf16.msra.mxu0 %v1840_v12 }
  0x6a   : > { %1659 = vmatpush3.bf16.msra.mxu1 %v1835_v8  ;;  %1724 = vmatprep.subr.bf16.mxu0 %v2042_v0 }
  0x6b   : > { %1660 = vmatprep.subr.bf16.mxu1 %v1837_v11 }
  0x6d   : > { %1725 = vmatpush3.bf16.msra.mxu0 %v1842_v14 }
  0x6e   : > { %1661 = vmatpush3.bf16.msra.mxu1 %v1837_v11  ;;  %1726 = vmatprep.subr.bf16.mxu0 %v2042_v0 }
  0x6f   : > { %1662 = vmatprep.subr.bf16.mxu1 %v1839_v13 }
  0x71   : > { %1727 = vmatpush3.bf16.msra.mxu0 %v1846_v16 }
  0x72   : > { %1663 = vmatpush3.bf16.msra.mxu1 %v1839_v13  ;;  %1728 = vmatprep.subr.bf16.mxu0 %v2042_v0 }
  0x73   : > { %1664 = vmatprep.subr.bf16.mxu1 %v1841_v15 }
  0x75   : > { %1729 = vmatpush3.bf16.msra.mxu0 %v1848_v19 }
  0x76   : > { %1665 = vmatpush3.bf16.msra.mxu1 %v1841_v15 }
  0x77   : > { %1682 = vmatprep.subr.bf16.mxu1 %v1845_v18 }
  0x78   : > { %1731 = vmatmul.mubr.bf16.vlgmr.msra.gmra.mrb[0].mxu0 %v1852_v22 }
  0x79   : > { %1667 = vmatmul.mubr.bf16.vlgmr.msra.gmra.mrb[0].mxu1 %v1844_v17  ;;  %1734 = vmatprep.mubr.msk.bf16.mxu0 %vm2043_vm0, %v2042_v0 }
  0x7a   : > { %1683 = vmatpush3.bf16.msra.mxu1 %v1845_v18  ;;  %1670 = vmatprep.mubr.bf16.mxu1 %v1849_v21 }
  0x7b   : > { %1684 = vmatprep.subr.bf16.mxu1 %v1847_v20 }
  0x7e   : > { %1685 = vmatpush3.bf16.msra.mxu1 %v1847_v20 }
  0x7f   : > { %1686 = vmatprep.subr.bf16.mxu1 %v1851_v23 }
  0x80   : > { %1735 = vmatmul.mubr.bf16.gmra.mrb[4].mxu0 %v1857_v27 }
  0x81   : > { %1671 = vmatmul.mubr.bf16.gmra.mrb[4].mxu1 %v1850_v24  ;;  %1738 = vmatprep.mubr.msk.bf16.mxu0 %vm2043_vm0, %v2042_v0 }
  0x82   : > { %1687 = vmatpush3.bf16.msra.mxu1 %v1851_v23  ;;  %1674 = vmatprep.mubr.bf16.mxu1 %v1854_v26 }
  0x83   : > { %1688 = vmatprep.subr.bf16.mxu1 %v1853_v25 }
  0x86   : > { %1689 = vmatpush3.bf16.msra.mxu1 %v1853_v25 }
  0x87   : > { %1690 = vmatprep.subr.bf16.mxu1 %v1856_v28 }
  0x88   : > { %1739 = vmatmul.mubr.bf16.gmra.mrb[8].mxu0 %v1862_v32 }
  0x89   : > { %1675 = vmatmul.mubr.bf16.gmra.mrb[8].mxu1 %v1855_v29  ;;  %1742 = vmatprep.mubr.msk.bf16.mxu0 %vm2043_vm0, %v2042_v0 }
  0x8a   : > { %1691 = vmatpush3.bf16.msra.mxu1 %v1856_v28  ;;  %1678 = vmatprep.mubr.bf16.mxu1 %v1859_v30 }
  0x8b   : > { %1692 = vmatprep.subr.bf16.mxu1 %v1858_v31 }
  0x8e   : > { %1693 = vmatpush3.bf16.msra.mxu1 %v1858_v31 }
  0x8f   : > { %1694 = vmatprep.subr.bf16.mxu1 %v1861_v33 }
  0x90   : > { %1743 = vmatmul.mubr.bf16.gmra.mrb[12].mxu0 %v1866_v37 }
  0x91   : > { %1679 = vmatmul.mubr.bf16.gmra.mrb[12].mxu1 %v1860_v34  ;;  %1746 = vmatprep.mubr.msk.bf16.mxu0 %vm2043_vm0, %v2042_v0 }
  0x92   : > { %1695 = vmatpush3.bf16.msra.mxu1 %v1861_v33  ;;  %1698 = vmatprep.mubr.bf16.mxu1 %v1864_v35 }
  0x93   : > { %1696 = vmatprep.subr.bf16.mxu1 %v1863_v36 }
  0x96   : > { %1697 = vmatpush3.bf16.msra.mxu1 %v1863_v36 }
  0x98   : > { %1747 = vmatmul.mubr.bf16.gmra.mrb[16].mxu0 %v1869_v40 }
  0x99   : > { %1699 = vmatmul.mubr.bf16.vlgmr.msra.gmra.mrb[16].mxu1 %v1865_v38  ;;  %1750 = vmatprep.mubr.msk.bf16.mxu0 %vm2043_vm0, %v2042_v0 }
  0x9a   : > { %1702 = vmatprep.mubr.bf16.mxu1 %v1867_v39 }
  0xa0   : > { %1751 = vmatmul.mubr.bf16.gmra.mrb[20].mxu0 %v1872_v43 }
  0xa1   : > { %1703 = vmatmul.mubr.bf16.gmra.mrb[20].mxu1 %v1868_v41  ;;  %1754 = vmatprep.mubr.msk.bf16.mxu0 %vm2043_vm0, %v2042_v0 }
  0xa2   : > { %1706 = vmatprep.mubr.bf16.mxu1 %v1870_v42 }
  0xa8   : > { %1755 = vmatmul.mubr.bf16.gmra.mrb[24].mxu0 %v1875_v46 }
  0xa9   : > { %1707 = vmatmul.mubr.bf16.gmra.mrb[24].mxu1 %v1871_v44 }
  0xaa   : > { %1710 = vmatprep.mubr.bf16.mxu1 %v1873_v45 }
  0xb1   : > { %1711 = vmatmul.mubr.bf16.gmra.mrb[28].mxu1 %v1874_v47 }
  0xb2   : > { %1947 = shalt.err (!%p1944_p7)
}
  0xb3   : > { %s1948_s24 = scalar_lea.hbm %s2301_s15, 128  ;;  %s1952_s25 = scalar_lea.hbm %s2449_s6, 256 }
  0xb4   : > { %p1949_p9 = scmp.ne.s32.totalorder %s2301_s15, %s1948_s24  ;;  %p1953_p5 = scmp.lt.u32.totalorder %s2301_s15, %s2449_s6 }
  0xb5   : > { %p1954_p13 = scmp.lt.u32.totalorder %s1952_s25, %s1948_s24  ;;  %p1956_p4 = scmp.lt.u32.totalorder %s1948_s24, %s2301_s15 }
  0xb6   : > { %p1950_p1 = pnand %p1949_p9, %p2178_p12 }
  0xb7   : > { %p1955_p2 = por %p1954_p13, %p1953_p5 }
  0xb8   : > { %p1951_p0 = pneg %p1950_p1 }
  0xb9   : > { %p1957_p6 = por %p1956_p4, %p1955_p2 }
  0xbb   : > { %p1958_p8 = pnand %p1957_p6, %p1951_p0 }
  0xbd   : > { %1961 = shalt.err (!%p1958_p8)
}
  0xbe   : > { %1767 = dma.vmem_to_hbm [thread:$0]  (%p2178_p12), %s1223_s29, 128, %s2301_s15, %s1193_s9   ;;  %v2324_v50 = vld [vmem:[%s2447_s4] ss:$0 sm:$0xff] }
  0xbf   : > { %s1483_s15 = smul.u32 2816, %s2105_s23  ;;  %s1206_s29 = sshll.u32 %s2293_s27, 4  ;;  %s2397_s29 = int_to_ptr.vmem [resolvable:$true] %s1206_s29 }
  0xc0   : > { %s1188_s23 = scalar_lea.sflag [#allocation4], %s2229_s17  ;;  %s1962_s14 = scalar_lea.vmem %s2397_s29, 2816 }
  0xc1   : > { %s2395_s12 = scalar_lea.hbm %s2448_s5, %s1483_s15  ;;  %p1963_p10 = scmp.ne.s32.totalorder %s2397_s29, %s1962_s14 }
  0xc2   : > { %s2046_s20 = smov [#allocation7]  }
  0xc3   : > { %p1964_p11 = pnand %p1963_p10, %p2178_p12  ;;  %s1966_s24 = sshll.u32 %s2046_s20, 4  ;;  %s1967_s24 = int_to_ptr.vmem [resolvable:$false] %s1966_s24 }
  0xc4   : > { %s1968_s11 = scalar_lea.vmem %s1967_s24, 5632  ;;  %p1969_p7 = scmp.lt.s32.totalorder %s2397_s29, %s1967_s24 }
  0xc5   : > { %p1965_p3 = pneg %p1964_p11  ;;  %p1970_p9 = scmp.lt.s32.totalorder %s1968_s11, %s1962_s14 }
  0xc7   : > { %p1971_p1 = por %p1970_p9, %p1969_p7 }
  0xc9   : > { %p1972_p0 = pnand %p1971_p1, %p1965_p3 }
 0x14b   : > { %v1065_v53 = vpop.f32.mrb[0].mxu0 }
 0x14c   : > { %v1668_v49 = vpop.f32.mrb[0].mxu1  ;;  %v1066_v57 = vadd.f32 %v2324_v50, %v1065_v53  ;;  %v1732_v58 = vpop.f32.mrb[1].mxu0 }
 0x14d   : > { %v465_v51 = vpop.f32.mrb[1].mxu1  ;;  %v474_v54 = vadd.f32 %v1668_v49, %v2324_v50  ;;  %v1068_v61 = vpop.f32.mrb[2].mxu0 }
 0x14e   : > { %v1669_v52 = vpop.f32.mrb[2].mxu1  ;;  %v466_v59 = vadd.f32 %v2324_v50, %v465_v51  ;;  %v1069_v63 = vadd.f32 %v2324_v50, %v1068_v61  ;;  %v1733_v0 = vpop.f32.mrb[3].mxu0 }
 0x14f   : > { %v477_v55 = vadd.f32 %v1669_v52, %v2324_v50  ;;  %v468_v56 = vpop.f32.mrb[3].mxu1 }
 0x150   : > { %v469_v60 = vadd.f32 %v2324_v50, %v468_v56  ;;  %v1557_v2 = vpack.c.bf16 %v1069_v63, %v1066_v57 }
 0x151   : > { %v1492_v62 = vpack.c.bf16 %v477_v55, %v474_v54 }
 0x152   : > { %v1487_v1 = vpack.c.bf16 %v469_v60, %v466_v59  ;;  %1597 = vst [vmem:[%s2293_s27 + $0x78] sm:$0xff] %v1557_v2  }
 0x153   : > { %1584 = vst [vmem:[%s2293_s27 + $0x8] sm:$0xff] %v1492_v62   ;;  %v1073_v6 = vpop.f32.mrb[4].mxu0 }
 0x154   : > { %1488 = vst [vmem:[%s2293_s27] sm:$0xff] %v1487_v1   ;;  %v1672_v3 = vpop.f32.mrb[4].mxu1  ;;  %v1074_v10 = vadd.f32 %v2324_v50, %v1073_v6  ;;  %v1736_v11 = vpop.f32.mrb[5].mxu0 }
 0x155   : > { %v481_v4 = vpop.f32.mrb[5].mxu1  ;;  %v490_v7 = vadd.f32 %v1672_v3, %v2324_v50  ;;  %v1076_v14 = vpop.f32.mrb[6].mxu0 }
 0x156   : > { %v1673_v5 = vpop.f32.mrb[6].mxu1  ;;  %v482_v12 = vadd.f32 %v2324_v50, %v481_v4  ;;  %v1077_v16 = vadd.f32 %v2324_v50, %v1076_v14  ;;  %v1737_v17 = vpop.f32.mrb[7].mxu0 }
 0x157   : > { %v493_v8 = vadd.f32 %v1673_v5, %v2324_v50  ;;  %v484_v9 = vpop.f32.mrb[7].mxu1 }
 0x158   : > { %v485_v13 = vadd.f32 %v2324_v50, %v484_v9  ;;  %v1562_v19 = vpack.c.bf16 %v1077_v16, %v1074_v10 }
 0x159   : > { %v1502_v15 = vpack.c.bf16 %v493_v8, %v490_v7 }
 0x15a   : > { %v1497_v18 = vpack.c.bf16 %v485_v13, %v482_v12  ;;  %1598 = vst [vmem:[%s2293_s27 + $0x80] sm:$0xff] %v1562_v19  }
 0x15b   : > { %1586 = vst [vmem:[%s2293_s27 + $0x18] sm:$0xff] %v1502_v15   ;;  %v1081_v23 = vpop.f32.mrb[8].mxu0 }
 0x15c   : > { %1585 = vst [vmem:[%s2293_s27 + $0x10] sm:$0xff] %v1497_v18   ;;  %v1676_v20 = vpop.f32.mrb[8].mxu1  ;;  %v1082_v27 = vadd.f32 %v2324_v50, %v1081_v23  ;;  %v1740_v28 = vpop.f32.mrb[9].mxu0 }
 0x15d   : > { %v497_v21 = vpop.f32.mrb[9].mxu1  ;;  %v506_v24 = vadd.f32 %v1676_v20, %v2324_v50  ;;  %v1084_v31 = vpop.f32.mrb[10].mxu0 }
 0x15e   : > { %v1677_v22 = vpop.f32.mrb[10].mxu1  ;;  %v498_v29 = vadd.f32 %v2324_v50, %v497_v21  ;;  %v1085_v33 = vadd.f32 %v2324_v50, %v1084_v31  ;;  %v1741_v34 = vpop.f32.mrb[11].mxu0 }
 0x15f   : > { %v509_v25 = vadd.f32 %v1677_v22, %v2324_v50  ;;  %v500_v26 = vpop.f32.mrb[11].mxu1 }
 0x160   : > { %v501_v30 = vadd.f32 %v2324_v50, %v500_v26  ;;  %v1567_v36 = vpack.c.bf16 %v1085_v33, %v1082_v27 }
 0x161   : > { %v1512_v32 = vpack.c.bf16 %v509_v25, %v506_v24 }
 0x162   : > { %v1507_v35 = vpack.c.bf16 %v501_v30, %v498_v29  ;;  %1599 = vst [vmem:[%s2293_s27 + $0x88] sm:$0xff] %v1567_v36  }
 0x163   : > { %1588 = vst [vmem:[%s2293_s27 + $0x28] sm:$0xff] %v1512_v32   ;;  %v1089_v41 = vpop.f32.mrb[12].mxu0 }
 0x164   : > { %1587 = vst [vmem:[%s2293_s27 + $0x20] sm:$0xff] %v1507_v35   ;;  %v1680_v37 = vpop.f32.mrb[12].mxu1  ;;  %v1090_v44 = vadd.f32 %v2324_v50, %v1089_v41  ;;  %v1744_v45 = vpop.f32.mrb[13].mxu0 }
 0x165   : > { %v522_v38 = vadd.f32 %v1680_v37, %v2324_v50  ;;  %v513_v39 = vpop.f32.mrb[13].mxu1  ;;  %v1092_v48 = vpop.f32.mrb[14].mxu0 }
 0x166   : > { %v1681_v40 = vpop.f32.mrb[14].mxu1  ;;  %v514_v46 = vadd.f32 %v2324_v50, %v513_v39  ;;  %v1093_v49 = vadd.f32 %v2324_v50, %v1092_v48  ;;  %v1745_v51 = vpop.f32.mrb[15].mxu0 }
 0x167   : > { %v1454_v42 = vpack.c.bf16 %v522_v38, %v522_v38  ;;  %v516_v43 = vpop.f32.mrb[15].mxu1 }
 0x168   : > { %v517_v47 = vadd.f32 %v2324_v50, %v516_v43  ;;  %v1572_v53 = vpack.c.bf16 %v1093_v49, %v1090_v44 }
 0x169   : > { %602 = vst [vmem:[%s2293_s27 + $0x38] sm:$0xf] %v1454_v42 }
 0x16a   : > { %v1517_v52 = vpack.c.bf16 %v517_v47, %v514_v46  ;;  %1600 = vst [vmem:[%s2293_s27 + $0x90] sm:$0xff] %v1572_v53  }
 0x16b   : > { %v1097_v58 = vpop.f32.mrb[16].mxu0 }
 0x16c   : > { %1589 = vst [vmem:[%s2293_s27 + $0x30] sm:$0xff] %v1517_v52   ;;  %v1700_v54 = vpop.f32.mrb[16].mxu1  ;;  %v1098_v60 = vadd.f32 %v2324_v50, %v1097_v58  ;;  %v1748_v61 = vpop.f32.mrb[17].mxu0 }
 0x16d   : > { %v769_v55 = vpop.f32.mrb[17].mxu1  ;;  %v778_v62 = vadd.f32 %v1700_v54, %v2324_v50  ;;  %v1100_v1 = vpop.f32.mrb[18].mxu0 }
 0x16e   : > { %v770_v56 = vadd.f32 %v2324_v50, %v769_v55  ;;  %v1701_v57 = vpop.f32.mrb[18].mxu1  ;;  %v1101_v2 = vadd.f32 %v2324_v50, %v1100_v1  ;;  %v1749_v3 = vpop.f32.mrb[19].mxu0 }
 0x16f   : > { %v772_v59 = vpop.f32.mrb[19].mxu1  ;;  %v781_v8 = vadd.f32 %v1701_v57, %v2324_v50 }
 0x170   : > { %v1455_v63 = vpack.c.bf16 %v770_v56, %v770_v56  ;;  %v773_v0 = vadd.f32 %v2324_v50, %v772_v59  ;;  %v1577_v5 = vpack.c.bf16 %v1101_v2, %v1098_v60 }
 0x172   : > { %892 = vst [vmem:[%s2293_s27 + $0x3c] sm:$0xf] %v1455_v63  ;;  %v1522_v4 = vpack.c.bf16 %v778_v62, %v773_v0  ;;  %1601 = vst [vmem:[%s2293_s27 + $0x98] sm:$0xff] %v1577_v5  }
 0x173   : > { %v1105_v11 = vpop.f32.mrb[20].mxu0 }
 0x174   : > { %1590 = vst [vmem:[%s2293_s27 + $0x40] sm:$0xff] %v1522_v4   ;;  %v1704_v6 = vpop.f32.mrb[20].mxu1  ;;  %v1106_v13 = vadd.f32 %v2324_v50, %v1105_v11  ;;  %v1752_v14 = vpop.f32.mrb[21].mxu0 }
 0x175   : > { %v785_v7 = vpop.f32.mrb[21].mxu1  ;;  %v794_v15 = vadd.f32 %v1704_v6, %v2324_v50  ;;  %v1108_v18 = vpop.f32.mrb[22].mxu0 }
 0x176   : > { %v786_v9 = vadd.f32 %v2324_v50, %v785_v7  ;;  %v1705_v10 = vpop.f32.mrb[22].mxu1  ;;  %v1109_v19 = vadd.f32 %v2324_v50, %v1108_v18  ;;  %v1753_v20 = vpop.f32.mrb[23].mxu0 }
 0x177   : > { %v788_v12 = vpop.f32.mrb[23].mxu1  ;;  %v797_v25 = vadd.f32 %v1705_v10, %v2324_v50 }
 0x178   : > { %v1527_v16 = vpack.c.bf16 %v786_v9, %v781_v8  ;;  %v789_v17 = vadd.f32 %v2324_v50, %v788_v12  ;;  %v1582_v22 = vpack.c.bf16 %v1109_v19, %v1106_v13 }
 0x17a   : > { %1591 = vst [vmem:[%s2293_s27 + $0x48] sm:$0xff] %v1527_v16   ;;  %v1532_v21 = vpack.c.bf16 %v794_v15, %v789_v17  ;;  %1602 = vst [vmem:[%s2293_s27 + $0xa0] sm:$0xff] %v1582_v22  }
 0x17b   : > { %v1113_v28 = vpop.f32.mrb[24].mxu0 }
 0x17c   : > { %1592 = vst [vmem:[%s2293_s27 + $0x50] sm:$0xff] %v1532_v21   ;;  %v1708_v23 = vpop.f32.mrb[24].mxu1  ;;  %v1114_v30 = vadd.f32 %v2324_v50, %v1113_v28  ;;  %v1756_v31 = vpop.f32.mrb[25].mxu0 }
 0x17d   : > { %v801_v24 = vpop.f32.mrb[25].mxu1  ;;  %v810_v32 = vadd.f32 %v1708_v23, %v2324_v50  ;;  %v1116_v35 = vpop.f32.mrb[26].mxu0 }
 0x17e   : > { %v802_v26 = vadd.f32 %v2324_v50, %v801_v24  ;;  %v1709_v27 = vpop.f32.mrb[26].mxu1  ;;  %v1482_v36 = vpack.c.bf16 %v1114_v30, %v1114_v30  ;;  %v1757_v37 = vpop.f32.mrb[27].mxu0 }
 0x17f   : > { %v804_v29 = vpop.f32.mrb[27].mxu1  ;;  %v813_v41 = vadd.f32 %v1709_v27, %v2324_v50 }
 0x180   : > { %v1537_v33 = vpack.c.bf16 %v802_v26, %v797_v25  ;;  %v805_v34 = vadd.f32 %v2324_v50, %v804_v29  ;;  %1184 = vst [vmem:[%s2293_s27 + $0xa8] sm:$0x3] %v1482_v36 }
 0x182   : > { %1593 = vst [vmem:[%s2293_s27 + $0x58] sm:$0xff] %v1537_v33   ;;  %v1542_v38 = vpack.c.bf16 %v810_v32, %v805_v34 }
 0x184   : > { %1594 = vst [vmem:[%s2293_s27 + $0x60] sm:$0xff] %v1542_v38   ;;  %v1712_v39 = vpop.f32.mrb[28].mxu1 }
 0x185   : > { %v817_v40 = vpop.f32.mrb[29].mxu1  ;;  %v826_v45 = vadd.f32 %v1712_v39, %v2324_v50 }
 0x186   : > { %v818_v42 = vadd.f32 %v2324_v50, %v817_v40  ;;  %v1713_v43 = vpop.f32.mrb[30].mxu1 }
 0x187   : > { %v820_v44 = vpop.f32.mrb[31].mxu1 }
 0x188   : > { %v1547_v46 = vpack.c.bf16 %v818_v42, %v813_v41  ;;  %v821_v47 = vadd.f32 %v2324_v50, %v820_v44 }
 0x18a   : > { %1595 = vst [vmem:[%s2293_s27 + $0x68] sm:$0xff] %v1547_v46   ;;  %v1552_v48 = vpack.c.bf16 %v826_v45, %v821_v47 }
 0x18c   : > { %1596 = vst [vmem:[%s2293_s27 + $0x70] sm:$0xff] %v1552_v48  }
 0x18d   : > { %1975 = shalt.err (!%p1972_p0)
}
 0x18e   : > { %s1976_s27 = scalar_lea.hbm %s2395_s12, 2816  ;;  %s1980_s18 = scalar_lea.hbm %s2448_s5, 5632 }
 0x18f   : > { %p1977_p5 = scmp.ne.s32.totalorder %s2395_s12, %s1976_s27  ;;  %p1981_p4 = scmp.lt.u32.totalorder %s2395_s12, %s2448_s5 }
 0x190   : > { %p1982_p6 = scmp.lt.u32.totalorder %s1980_s18, %s1976_s27  ;;  %p1984_p10 = scmp.lt.u32.totalorder %s1976_s27, %s2395_s12 }
 0x191   : > { %p1978_p13 = pnand %p1977_p5, %p2178_p12 }
 0x192   : > { %p1983_p8 = por %p1982_p6, %p1981_p4 }
 0x193   : > { %p1979_p2 = pneg %p1978_p13 }
 0x194   : > { %p1985_p11 = por %p1984_p10, %p1983_p8 }
 0x196   : > { %p1986_p3 = pnand %p1985_p11, %p1979_p2 }
 0x198   : > { %1989 = shalt.err (!%p1986_p3)
}
 0x199   : > { %s2047_s16 = smov 64   ;;  %s2048_s15 = smov 4  }
 0x19a   : > { %1766 = dma.vmem_to_hbm [thread:$0]  (%p2178_p12), %s2397_s29, 2816, %s2395_s12, %s1188_s23, %s2047_s16, %s2047_s16, %s2048_s15  }
 0x19b PF: > { %s1234_s9 = sand.u32 1, %s2024_s2   ;;  %p2464_p7 = scmp.ne.s32.totalorder %s2454_s26, 0 }
 0x19c   : > { %p2465_p9 = scmp.ge.s32.totalorder %s2036_s22, 2  ;;  %s1235_s30 = scalar_lea.sflag [#allocation4], %s1234_s9 }
 0x19e   : > { %p1779_p1 = pnand %p2465_p9, %p2464_p7 }
 0x1a0   : > { %2015 = dma.done.wait (!%p1779_p1), %s1235_s30, 2816  }
 0x1a1   : > { %2017 = vsyncadd (!%p1779_p1), %s1235_s30, 4294964480  ;;  %s1244_s14 = scalar_lea.sflag [#allocation9], %s1234_s9 }
 0x1a2   : > { %2019 = dma.done.wait (!%p1779_p1), %s1244_s14, 128  }
 0x1a3   : > { %2021 = vsyncadd (!%p1779_p1), %s1244_s14, 4294967168  ;;  %p24_p12 = scmp.ge.s32.totalorder %s2140_s7, 4   ;;  %s2466_s2 = smov %s2028_s21 }
 0x1a4   : > { %s2467_s21 = smov %s2032_s3  ;;  %s2468_s3 = smov %s2174_s28 }
 0x1a5   : > { %s2469_s22 = smov %s2140_s7  ;;  %26 = sbr.rel (!%p24_p12) target bundleno = 8 (0x8), region = 106 }
 0x1ac   :  { %1249 = vsyncpa [#allocation3], 1 }
 0x1ad   :  { %1251 = vsyncpa [#allocation3 + $0x1], 1 }
 0x1ae   :  { %1252 = vsyncpa [#allocation6], 1 }
 0x1af   :  { %1253 = vsyncpa [#allocation4], 1 }
 0x1b0   :  { %1255 = vsyncpa [#allocation4 + $0x1], 1 }
 0x1b1   :  { %1256 = vsyncpa [#allocation9], 1 }
 0x1b2   :  { %1258 = vsyncpa [#allocation9 + $0x1], 1 }

</bundles_post_ra>
